<compile_context>
chip_gen: v7x
topology: tpu7x:2x2x1
jax: 0.10.0
libtpu: 0.0.40
codegen_flags: <defaults>
</compile_context>

<pallas_src>
import functools

import jax
import jax.numpy as jnp
from jax.experimental import pallas as pl
from jax.experimental.pallas import tpu as pltpu


def _mask_kernel(pooler_scale, dm_ref, box_ref, r_ref, c_ref, proto_ref, out_ref):
    # dm_ref:    (1, max_obj, nm)       bf16 mask coefficients (selected boxes)
    # box_ref:   (1, max_obj, 4)        f32 detected boxes (xyxy, image scale)
    # r_ref:     (1, TILE_HW)           f32 column (x) coordinate of each pixel
    # c_ref:     (1, TILE_HW)           f32 row    (y) coordinate of each pixel
    # proto_ref: (1, nm, TILE_HW)       bf16 prototype masks (this batch, HW tile)
    # out_ref:   (1, max_obj, TILE_HW)  f32 cropped sigmoid masks
    dm = dm_ref[0]                                    # (max_obj, nm)
    pr = proto_ref[0]                                 # (nm, TILE_HW)

    m = jnp.dot(dm, pr, preferred_element_type=jnp.float32)   # MXU, f32 acc
    m = jax.nn.sigmoid(m)                             # (max_obj, TILE_HW)

    bx = box_ref[0] * pooler_scale                    # downsampled bboxes
    x1 = bx[:, 0:1]
    y1 = bx[:, 1:2]
    x2 = bx[:, 2:3]
    y2 = bx[:, 3:4]

    r = r_ref[...]                                    # (1, TILE_HW)
    c = c_ref[...]                                    # (1, TILE_HW)
    inside = (r >= x1) & (r < x2) & (c >= y1) & (c < y2)   # (max_obj, TILE_HW)

    out_ref[0] = jnp.where(inside, m, jnp.float32(0.0))


def _pick_hw_tile(hw, max_tile=2048):
    """Largest multiple of 128 that divides HW and is <= max_tile; else HW."""
    for t in range(max_tile, 127, -128):
        if hw % t == 0:
            return t
    return hw


def onnx_trt2_forward(x0, proto, *, nc=8, max_obj=16, pooler_scale=0.25,
                      nms_key=None):
    """JAX/Pallas port of ONNX_TRT2.forward.

    x0:    (B, num_boxes, 5 + nc + nm)  float32
    proto: (B, nm, H, W)                float32
    Returns (num_det, det_boxes, det_scores, det_classes, masks) with
    masks of shape (B, max_obj, H*W), float32.
    """
    B, num_boxes, _ = x0.shape
    _, nm, H, W = proto.shape
    HW = H * W

    mask_coefs = x0[:, :, 5 + nc:5 + nc + nm]            # (B, num_boxes, nm)

    # --- TRT_NMS4 stub: the reference op emits random tensors of the right
    # shapes; replicate that deterministically with jax.random. -------------
    if nms_key is None:
        nms_key = jax.random.PRNGKey(1)
    k1, k2, k3, k4, k5 = jax.random.split(nms_key, 5)
    num_det = jax.random.randint(k1, (B, 1), 0, max_obj, dtype=jnp.int32)
    det_boxes = jax.random.normal(k2, (B, max_obj, 4), dtype=x0.dtype)
    det_scores = jax.random.normal(k3, (B, max_obj), dtype=x0.dtype)
    det_classes = jax.random.randint(k4, (B, max_obj), 0, nc, dtype=jnp.int32)
    det_indices = jax.random.randint(k5, (B, max_obj), 0, num_boxes, dtype=jnp.int32)

    # Gather mask coefficients of the selected detections (glue, tiny), bf16.
    det_masks = jnp.take_along_axis(
        mask_coefs, det_indices[..., None], axis=1).astype(jnp.bfloat16)       # (B, max_obj, nm)

    # Proto in bf16: halves the dominant HBM read stream (kernel is mem-bound).
    proto_flat = proto.reshape(B, nm, HW).astype(jnp.bfloat16)                 # (B, nm, HW)

    # Precomputed crop coordinates (x = column, y = row), streamed per HW tile.
    k = jnp.arange(HW, dtype=jnp.int32)
    r_full = (k % W).astype(jnp.float32)[None, :]        # (1, HW) column index
    c_full = (k // W).astype(jnp.float32)[None, :]       # (1, HW) row index

    det_boxes_f32 = det_boxes.astype(jnp.float32)

    tile_hw = _pick_hw_tile(HW)
    n_hw_tiles = HW // tile_hw

    # Per-step VMEM footprint (double-buffered by Pallas); keep explicit
    # headroom so real proto sizes stay within v5e/v7x scoped VMEM.
    block_bytes = (max_obj * nm * 2 + max_obj * 4 * 4 + 2 * tile_hw * 4
                   + nm * tile_hw * 2 + max_obj * tile_hw * 4)
    vmem_limit = int(min(96 * 1024 * 1024, max(4 * 1024 * 1024, 4 * block_bytes)))

    kernel = functools.partial(_mask_kernel, float(pooler_scale))
    masks = pl.pallas_call(
        kernel,
        out_shape=jax.ShapeDtypeStruct((B, max_obj, HW), jnp.float32),
        grid=(B, n_hw_tiles),
        in_specs=[
            pl.BlockSpec((1, max_obj, nm), lambda b, t: (b, 0, 0)),      # dm
            pl.BlockSpec((1, max_obj, 4), lambda b, t: (b, 0, 0)),       # boxes
            pl.BlockSpec((1, tile_hw), lambda b, t: (0, t)),             # r (x)
            pl.BlockSpec((1, tile_hw), lambda b, t: (0, t)),             # c (y)
            pl.BlockSpec((1, nm, tile_hw), lambda b, t: (b, 0, t)),      # proto
        ],
        out_specs=pl.BlockSpec((1, max_obj, tile_hw), lambda b, t: (b, 0, t)),
        compiler_params=pltpu.CompilerParams(
            dimension_semantics=("parallel", "parallel"),
            vmem_limit_bytes=vmem_limit,
        ),
    )(det_masks, det_boxes_f32, r_full, c_full, proto_flat)

    return num_det, det_boxes, det_scores, det_classes, masks


if __name__ == "__main__":
    # Small synthetic shapes consistent with the module's forward.
    B = 2
    num_boxes = 64
    nc = 8          # number of classes
    nm = 32         # prototype channels
    H = W = 16      # prototype spatial size
    max_obj = 16

    key = jax.random.PRNGKey(0)
    kx, kp = jax.random.split(key)
    x0 = jax.random.normal(kx, (B, num_boxes, 5 + nc + nm), dtype=jnp.float32)
    proto = jax.random.normal(kp, (B, nm, H, W), dtype=jnp.float32)

    num_det, det_boxes, det_scores, det_classes, masks = onnx_trt2_forward(
        x0, proto, nc=nc, max_obj=max_obj, pooler_scale=0.25)

    jax.block_until_ready(masks)
    assert masks.shape == (B, max_obj, H * W)
    assert masks.dtype == jnp.float32
    assert num_det.shape == (B, 1)
    assert det_boxes.shape == (B, max_obj, 4)
    assert det_scores.shape == (B, max_obj)
    assert det_classes.shape == (B, max_obj)
    print("KERNEL_OK")
</pallas_src>

<mosaic_0001>
module attributes {stable_mosaic.version = 11 : i64} {
  func.func @_mask_kernel(%arg0: i32, %arg1: i32, %arg2: memref<1x16x32xbf16, #tpu.memory_space<vmem>>, %arg3: memref<1x16x4xf32, #tpu.memory_space<vmem>>, %arg4: memref<1x256xf32, #tpu.memory_space<vmem>>, %arg5: memref<1x256xf32, #tpu.memory_space<vmem>>, %arg6: memref<1x32x256xbf16, #tpu.memory_space<vmem>>, %arg7: memref<1x16x256xf32, #tpu.memory_space<vmem>>) attributes {dimension_semantics = [#tpu.dimension_semantics<parallel>, #tpu.dimension_semantics<parallel>], iteration_bounds = array<i64: 2, 1>, scalar_prefetch = 0 : i64, scratch_operands = 0 : i64, tpu.core_type = #tpu.core_type<tc>, window_params = [{transform_indices = @transform_0, window_bounds = array<i64: 1, 16, 32>}, {transform_indices = @transform_1, window_bounds = array<i64: 1, 16, 4>}, {transform_indices = @transform_2, window_bounds = array<i64: 1, 256>}, {transform_indices = @transform_3, window_bounds = array<i64: 1, 256>}, {transform_indices = @transform_4, window_bounds = array<i64: 1, 32, 256>}, {transform_indices = @transform_5, window_bounds = array<i64: 1, 16, 256>}]} {
    %c0 = arith.constant 0 : index
    %c0_0 = arith.constant 0 : index
    %c0_1 = arith.constant 0 : index
    %0 = vector.load %arg2[%c0, %c0_0, %c0_1] : memref<1x16x32xbf16, #tpu.memory_space<vmem>>, vector<1x16x32xbf16>
    %1 = vector.shape_cast %0 : vector<1x16x32xbf16> to vector<16x32xbf16>
    %c0_2 = arith.constant 0 : index
    %c0_3 = arith.constant 0 : index
    %c0_4 = arith.constant 0 : index
    %2 = vector.load %arg6[%c0_2, %c0_3, %c0_4] : memref<1x32x256xbf16, #tpu.memory_space<vmem>>, vector<1x32x256xbf16>
    %3 = vector.shape_cast %2 : vector<1x32x256xbf16> to vector<32x256xbf16>
    %cst = arith.constant dense<0.000000e+00> : vector<16x256xf32>
    %4 = tpu.matmul %1, %3, %cst {dimension_numbers = #tpu.dot_dimension_numbers<[1], [0], [0], [1], [0, 0, 1, 1], [], []>} : vector<16x32xbf16>, vector<32x256xbf16>, vector<16x256xf32> -> vector<16x256xf32>
    %5 = arith.negf %4 : vector<16x256xf32>
    %6 = math.exp %5 : vector<16x256xf32>
    %cst_5 = arith.constant 1.000000e+00 : f32
    %7 = vector.broadcast %cst_5 : f32 to vector<16x256xf32>
    %8 = arith.addf %7, %6 : vector<16x256xf32>
    %9 = arith.divf %7, %8 : vector<16x256xf32>
    %c0_6 = arith.constant 0 : index
    %c0_7 = arith.constant 0 : index
    %c0_8 = arith.constant 0 : index
    %10 = vector.load %arg3[%c0_6, %c0_7, %c0_8] : memref<1x16x4xf32, #tpu.memory_space<vmem>>, vector<1x16x4xf32>
    %11 = vector.shape_cast %10 : vector<1x16x4xf32> to vector<16x4xf32>
    %cst_9 = arith.constant 2.500000e-01 : f32
    %12 = vector.broadcast %cst_9 : f32 to vector<16x4xf32>
    %13 = arith.mulf %11, %12 : vector<16x4xf32>
    %14 = vector.extract_strided_slice %13 {offsets = [0, 0], sizes = [16, 1], strides = [1, 1]} : vector<16x4xf32> to vector<16x1xf32>
    %15 = vector.extract_strided_slice %13 {offsets = [0, 1], sizes = [16, 1], strides = [1, 1]} : vector<16x4xf32> to vector<16x1xf32>
    %16 = vector.extract_strided_slice %13 {offsets = [0, 2], sizes = [16, 1], strides = [1, 1]} : vector<16x4xf32> to vector<16x1xf32>
    %17 = vector.extract_strided_slice %13 {offsets = [0, 3], sizes = [16, 1], strides = [1, 1]} : vector<16x4xf32> to vector<16x1xf32>
    %c0_10 = arith.constant 0 : index
    %c0_11 = arith.constant 0 : index
    %18 = vector.load %arg4[%c0_10, %c0_11] : memref<1x256xf32, #tpu.memory_space<vmem>>, vector<1x256xf32>
    %c0_12 = arith.constant 0 : index
    %c0_13 = arith.constant 0 : index
    %19 = vector.load %arg5[%c0_12, %c0_13] : memref<1x256xf32, #tpu.memory_space<vmem>>, vector<1x256xf32>
    %20 = vector.broadcast %18 : vector<1x256xf32> to vector<16x256xf32>
    %21 = vector.broadcast %14 : vector<16x1xf32> to vector<16x256xf32>
    %22 = arith.cmpf oge, %20, %21 : vector<16x256xf32>
    %23 = vector.broadcast %18 : vector<1x256xf32> to vector<16x256xf32>
    %24 = vector.broadcast %16 : vector<16x1xf32> to vector<16x256xf32>
    %25 = arith.cmpf olt, %23, %24 : vector<16x256xf32>
    %26 = arith.andi %22, %25 : vector<16x256xi1>
    %27 = vector.broadcast %19 : vector<1x256xf32> to vector<16x256xf32>
    %28 = vector.broadcast %15 : vector<16x1xf32> to vector<16x256xf32>
    %29 = arith.cmpf oge, %27, %28 : vector<16x256xf32>
    %30 = arith.andi %26, %29 : vector<16x256xi1>
    %31 = vector.broadcast %19 : vector<1x256xf32> to vector<16x256xf32>
    %32 = vector.broadcast %17 : vector<16x1xf32> to vector<16x256xf32>
    %33 = arith.cmpf olt, %31, %32 : vector<16x256xf32>
    %34 = arith.andi %30, %33 : vector<16x256xi1>
    %cst_14 = arith.constant 0.000000e+00 : f32
    %35 = vector.broadcast %cst_14 : f32 to vector<16x256xf32>
    %36 = arith.select %34, %9, %35 : vector<16x256xi1>, vector<16x256xf32>
    %c0_15 = arith.constant 0 : index
    %c0_16 = arith.constant 0 : index
    %c0_17 = arith.constant 0 : index
    %37 = vector.load %arg7[%c0_15, %c0_16, %c0_17] : memref<1x16x256xf32, #tpu.memory_space<vmem>>, vector<1x16x256xf32>
    %38 = vector.shape_cast %37 : vector<1x16x256xf32> to vector<16x256xf32>
    %39 = vector.shape_cast %36 : vector<16x256xf32> to vector<1x16x256xf32>
    tpu.vector_store %arg7[%c0_15, %c0_16, %c0_17], %39 {strides = array<i32>} : memref<1x16x256xf32, #tpu.memory_space<vmem>>, vector<1x16x256xf32>,
    return
  }
  func.func @transform_0(%arg0: i32, %arg1: i32) -> (i32, i32, i32) {
    %c0_i32 = arith.constant 0 : i32
    %c0_i32_0 = arith.constant 0 : i32
    %c0_i32_1 = arith.constant 0 : i32
    return %arg0, %c0_i32, %c0_i32_0 : i32, i32, i32
  }
  func.func @transform_1(%arg0: i32, %arg1: i32) -> (i32, i32, i32) {
    %c0_i32 = arith.constant 0 : i32
    %c0_i32_0 = arith.constant 0 : i32
    %c0_i32_1 = arith.constant 0 : i32
    return %arg0, %c0_i32, %c0_i32_0 : i32, i32, i32
  }
  func.func @transform_2(%arg0: i32, %arg1: i32) -> (i32, i32) {
    %c0_i32 = arith.constant 0 : i32
    %c0_i32_0 = arith.constant 0 : i32
    return %c0_i32, %arg1 : i32, i32
  }
  func.func @transform_3(%arg0: i32, %arg1: i32) -> (i32, i32) {
    %c0_i32 = arith.constant 0 : i32
    %c0_i32_0 = arith.constant 0 : i32
    return %c0_i32, %arg1 : i32, i32
  }
  func.func @transform_4(%arg0: i32, %arg1: i32) -> (i32, i32, i32) {
    %c0_i32 = arith.constant 0 : i32
    %c0_i32_0 = arith.constant 0 : i32
    return %arg0, %c0_i32, %arg1 : i32, i32, i32
  }
  func.func @transform_5(%arg0: i32, %arg1: i32) -> (i32, i32, i32) {
    %c0_i32 = arith.constant 0 : i32
    %c0_i32_0 = arith.constant 0 : i32
    return %arg0, %c0_i32, %arg1 : i32, i32, i32
  }
}

</mosaic_0001>

<bundles_post_ra>
// kernel: tpu_custom_call.1
= control target key start
LH: loop header
LB: loop body
LE: loop exit
PB: predicated region body
PF: predicated region fallthrough
CT: control target
= control target key end

     0   :  { %10 = vsyncpa [#allocation3], 0  ;;  %s1186_s0 = inlined_call_operand.vmem [shape: bf16[2,16,32], index: 0, kind: input, shape index: {}]   ;;  %s1187_s1 = inlined_call_operand.vmem [shape: f32[2,16,4], index: 1, kind: input, shape index: {}]   ;;  %s1188_s2 = inlined_call_operand.vmem [shape: f32[1,256], index: 2, kind: input, shape index: {}]   ;;  %s1189_s3 = inlined_call_operand.vmem [shape: f32[1,256], index: 3, kind: input, shape index: {}]   ;;  %s1190_s4 = inlined_call_operand.hbm [shape: bf16[2,32,256], index: 4, kind: input, shape index: {}]   ;;  %s1191_s5 = inlined_call_operand.hbm [shape: f32[2,16,256], index: 5, kind: output, shape index: {}]  }
   0x1   :  { %12 = vsyncpa [#allocation3 + $0x1], 0 }
   0x2   :  { %13 = vsyncpa [#allocation4], 0 }
   0x3   :  { %15 = vsyncpa [#allocation4 + $0x1], 0  ;;  %s981_s18 = smov 0   ;;  %s983_s19 = smov 0  }
   0x4   :  { %s985_s20 = smov 0   ;;  %s987_s21 = smov 0  }
   0x5   :  { %s989_s22 = smov 0   ;;  %s991_s23 = smov 0  }
   0x6 LB: > { %s693_s24 = sadd.s32 4294967295, %s939_s23   ;;  %s694_s25 = sadd.s32 4294967294, %s939_s23   ;;  %s939_s23 = sphi %s991_s23, %s21_s23   ;;  %s935_s22 = sphi %s989_s22, %s1210_s22   ;;  %s931_s21 = sphi %s987_s21, %s1209_s21   ;;  %s927_s20 = sphi %s985_s20, %s1208_s20   ;;  %s923_s19 = sphi %s983_s19, %s1207_s19   ;;  %s919_s18 = sphi %s981_s18, %s1206_s18  }
   0x7   : > { %s33_s26 = sadd.s32 1, %s935_s22  ;;  %s146_s27 = sadd.s32 1, %s927_s20 }
   0x8   : > { %p35_p0 = scmp.ge.s32.totalorder %s33_s26, 2  ;;  %p153_p1 = scmp.ne.s32.totalorder %s927_s20, %s923_s19 }
   0x9   : > { %p154_p2 = scmp.eq.s32.totalorder %s939_s23, 0  ;;  %p159_p3 = scmp.ne.s32.totalorder %s923_s19, %s919_s18 }
   0xa   : > { %s1212_s26 = smov (%p35_p0, %s33_s26), 0  ;;  %p160_p5 = scmp.eq.s32.totalorder %s693_s24, 0 }
   0xb   : > { %p1022_p4 = por %p154_p2, %p153_p1  ;;  %s141_s29 = ssub.s32 %s935_s22, %s1212_s26 }
   0xc   : > { %p185_p6 = scmp.eq.s32.totalorder %s693_s24, 1  ;;  %p144_p7 = scmp.eq.s32.totalorder %s141_s29, 0 }
   0xd   : > { %p1028_p8 = por %p160_p5, %p159_p3  ;;  %p191_p10 = scmp.eq.s32.totalorder %s694_s25, 1 }
   0xe   : > { %p1032_p9 = por %p185_p6, %p153_p1  ;;  %p740_p13 = scmp.lt.s32.totalorder %s939_s23, 2 }
   0xf   : > { %s1037_s7 = scalar_select %p144_p7, %s927_s20, %s146_s27  }
  0x10   : > { %s1195_s6 = scalar_select %p1032_p9, 1, 0 }
  0x11   : > { %p1039_p11 = por %p191_p10, %p159_p3  ;;  %s243_s9 = sand.u32 1, %s927_s20  }
  0x12   : > { %s699_s10 = sshll.u32 %s243_s9, 5  ;;  %s724_s11 = sshll.u32 %s935_s22, 9 }
  0x13   : > { %s1196_s8 = scalar_select %p1039_p11, 1, 0 }
  0x14   : > { %s1050_s14 = scalar_lea.hbm %s1190_s4, %s724_s11  ;;  %s247_s15 = scalar_lea.vmem [#allocation2], %s699_s10 }
  0x15   : > { %s256_s16 = sshll.u32 %s247_s15, 4  ;;  %p1056_p0 = pnand %p740_p13, %p1022_p4  ;;  %s1052_s16 = int_to_ptr.vmem [resolvable:$true] %s256_s16 }
  0x16   : > { %s1061_s24 = scalar_lea.sflag [#allocation3], %s243_s9  ;;  %s827_s25 = scalar_lea.hbm %s1050_s14, 512 }
  0x17   : > { %p828_p2 = scmp.ne.s32.totalorder %s1050_s14, %s827_s25  ;;  %p829_p3 = pneg %p1056_p0 }
  0x18   : > { %s832_s28 = scalar_lea.hbm %s1190_s4, 1024  ;;  %p833_p4 = scmp.lt.u32.totalorder %s1050_s14, %s1190_s4 }
  0x19   : > { %p830_p5 = pnand %p829_p3, %p828_p2  ;;  %p834_p7 = scmp.lt.u32.totalorder %s832_s28, %s827_s25 }
  0x1a   : > { %p836_p13 = scmp.lt.u32.totalorder %s827_s25, %s1050_s14 }
  0x1b   : > { %p831_p6 = pneg %p830_p5  ;;  %p835_p10 = por %p834_p7, %p833_p4 }
  0x1d   : > { %p837_p12 = por %p836_p13, %p835_p10 }
  0x1f   : > { %p838_p1 = pnand %p837_p12, %p831_p6 }
  0x21   : > { %841 = shalt.err (!%p838_p1)
}
  0x22   : > { %s842_s9 = scalar_lea.vmem %s1052_s16, 512  ;;  %s941_s12 = smov [#allocation2]  }
  0x23   : > { %p843_p2 = scmp.ne.s32.totalorder %s1052_s16, %s842_s9  ;;  %s847_s13 = sshll.u32 %s941_s12, 4  ;;  %s848_s13 = int_to_ptr.vmem [resolvable:$false] %s847_s13 }
  0x24   : > { %s849_s15 = scalar_lea.vmem %s848_s13, 1024  ;;  %p850_p9 = scmp.lt.s32.totalorder %s1052_s16, %s848_s13 }
  0x25   : > { %p845_p5 = pnand %p843_p2, %p829_p3  ;;  %p851_p4 = scmp.lt.s32.totalorder %s849_s15, %s842_s9 }
  0x27   : > { %p846_p11 = pneg %p845_p5  ;;  %p852_p7 = por %p851_p4, %p850_p9 }
  0x29   : > { %p853_p10 = pnand %p852_p7, %p846_p11 }
  0x2b   : > { %856 = shalt.err (!%p853_p10)
}
  0x2c   : > { %s942_s25 = smov 128   ;;  %s943_s27 = smov 8  }
  0x2d   : > { %735 = dma.hbm_to_vmem [thread:$0]  (!%p1056_p0), %s1050_s14, 512, %s1052_s16, %s1061_s24, %s942_s25, %s942_s25, %s943_s27  }
  0x2e   : > { %p264_p12 = scmp.lt.s32.totalorder %s939_s23, 3  ;;  %p1198_p1 = scmp.ge.s32.totalorder %s939_s23, 1 }
  0x30   : > { %p265_p3 = pnand %p1198_p1, %p264_p12 }
  0x31   : > { %s1093_s29 = sand.u32 (!%p265_p3), 1, %s923_s19  }
  0x32   : > { %268 = sbr.rel (%p265_p3) target bundleno = 325 (0x145), region = 40  ;;  %s703_s28 = sshll.u32 (!%p265_p3), %s1093_s29, 5 }
  0x33   : > { %s271_s10 = scalar_lea.sflag (!%p265_p3), [#allocation3], %s1093_s29  ;;  %s274_s11 = scalar_lea.vmem (!%p265_p3), [#allocation2], %s703_s28 }
  0x39   : > { %910 = dma.done.wait (%p1028_p8), %s271_s10, 512  }
  0x3a   : > { %912 = vsyncadd (%p1028_p8), %s271_s10, 4294966784  ;;  %p319_p9 = scmp.lt.s32.totalorder %s931_s21, 1  ;;  %v944_v0 = vmov 0   ;;  %v945_v1 = vmov 2   ;;  %v804_v2 = vld [vmem:[%s274_s11 + $0x4] ss:$8 sps:$4 sm:$0xff]   ;;  %v451_v13 = vlaneseq }
  0x3b   : > { %409 = vmatprep.mubr.bf16.mxu0 %v944_v0  ;;  %799 = vset.pattern.permute.xlu1 %v945_v1  ;;  %v806_v3 = vld [vmem:[%s274_s11] ss:$8 sps:$4 sm:$0xff]   ;;  %v807_v4 = vld [vmem:[%s274_s11 + $0x14] ss:$8 sps:$4 sm:$0xff]   ;;  %v809_v5 = vld [vmem:[%s274_s11 + $0x10] ss:$8 sps:$4 sm:$0xff]  }
  0x3c   : > { %s320_s14 = scalar_select %p319_p9, %s931_s21, 1  ;;  %798 = vset.pattern.permute.xlu0 %v944_v0  ;;  %377 = vmatprep.subr.bf16.mxu0 %v804_v2  ;;  %vm373_vm0 = vcmask 261120   ;;  %v946_v11 = vmov 1   ;;  %v947_v12 = vmov 3   ;;  %v452_v21 = vshrl.u32 %v451_v13, 7 }
  0x3d   : > { %378 = vmatpush1.bf16.msra.mxu0 %v806_v3  ;;  %v448_v26 = vld [vmem:[%s1188_s2] sm:$0x3]  ;;  %s543_s9 = scalar_lea.sflag [#allocation4], %s1093_s29  ;;  %p1203_p11 = scmp.ne.s32.totalorder %s1195_s6, 0 }
  0x3e   : > { %s726_s16 = sshll.u32 %s320_s14, 4  ;;  %s725_s17 = sshll.u32 %s320_s14, 3  ;;  %379 = vmatprep.subr.bf16.mxu0 %v807_v4  ;;  %v453_v25 = vsub.s32 0, %v452_v21  ;;  %v457_v28 = vsub.s32 1, %v452_v21  ;;  %v449_v31 = vld [vmem:[%s1189_s3] sm:$0x3] }
  0x3f   : > { %s328_s12 = scalar_lea.vmem %s1187_s1, %s726_s16  ;;  %s323_s15 = scalar_lea.vmem %s1186_s0, %s725_s17 }
  0x40   : > { %v444_v6 = vld [vmem:[%s328_s12] sm:$0xff]  ;;  %v445_v8 = vld [vmem:[%s328_s12 + $0x8] sm:$0xff]  ;;  %v454_v30 = vrot.slane %v448_v26, %v453_v25  ;;  %v458_v33 = vrot.slane %v448_v26, %v457_v28  ;;  %v495_v36 = vrot.slane %v449_v31, %v453_v25  ;;  %v499_v40 = vrot.slane %v449_v31, %v457_v28  ;;  %s318_s14 = scalar_lea.vmem [#allocation5], %s703_s28  ;;  %s727_s17 = sshll.u32 %s931_s21, 9 }
  0x41   : > { %v446_v7 = vmul.f32 0.25, %v444_v6  ;;  %v810_v9 = vld [vmem:[%s323_s15] sm:$0xff]   ;;  %v447_v10 = vmul.f32 0.25, %v445_v8  ;;  %380 = vmatpush1.bf16.msra.mxu0 %v809_v5  ;;  %s558_s16 = sshll.u32 %s318_s14, 4  ;;  %s1135_s24 = scalar_lea.hbm %s1191_s5, %s727_s17  ;;  %s1128_s16 = int_to_ptr.vmem [resolvable:$true] %s558_s16 }
  0x42   : > { %s857_s12 = scalar_lea.vmem %s1128_s16, 512  ;;  %s948_s13 = smov [#allocation5]  }
  0x43   : > { %476 = vperm.xlu1 %799, %v446_v7   ;;  %463 = vperm.xlu0 %798, %v446_v7   ;;  %p858_p8 = scmp.ne.s32.totalorder %s1128_s16, %s857_s12  ;;  %s861_s30 = sshll.u32 %s948_s13, 4  ;;  %s862_s30 = int_to_ptr.vmem [resolvable:$false] %s861_s30 }
  0x44   : > { %714 = vmatmul.mubr.msk.bf16.vlgmr.msra.gmra.mrb[0].mxu0 %vm373_vm0, %v810_v9  ;;  %s863_s15 = scalar_lea.vmem %s862_s30, 1024  ;;  %p864_p13 = scmp.lt.s32.totalorder %s1128_s16, %s862_s30 }
  0x45   : > { %p859_p0 = pnand %p858_p8, %p1203_p11  ;;  %p865_p2 = scmp.lt.s32.totalorder %s863_s15, %s857_s12 }
  0x47   : > { %480 = vperm.xlu1 %799, %v447_v10   ;;  %468 = vperm.xlu0 %798, %v447_v10   ;;  %p860_p6 = pneg %p859_p0  ;;  %p866_p5 = por %p865_p2, %p864_p13 }
  0x49   : > { %p867_p4 = pnand %p866_p5, %p860_p6 }
  0x4b   : > { %801 = vset.pattern.permute.xlu1 %v946_v11  ;;  %800 = vset.pattern.permute.xlu0 %v946_v11 }
  0x4c   : > { %507 = vperm.xlu1 %801, %v447_v10   ;;  %503 = vperm.xlu0 %800, %v446_v7  }
  0x50   : > { %802 = vset.pattern.permute.xlu1 %v947_v12  ;;  %803 = vset.pattern.permute.xlu0 %v947_v12 }
  0x51   : > { %519 = vperm.xlu1 %802, %v446_v7   ;;  %523 = vperm.xlu0 %803, %v447_v10  }
  0xc2   : > { %v477_v19 = vpop.permute.xlu1 %476  ;;  %v464_v23 = vpop.permute.xlu0 %463 }
  0xc3   : > { %vm483_vm1 = vcmp.lt.f32.partialorder %v454_v30, %v477_v19  ;;  %vm471_vm2 = vcmp.ge.f32.partialorder %v454_v30, %v464_v23  ;;  %vm484_vm5 = vcmp.lt.f32.partialorder %v458_v33, %v477_v19  ;;  %vm472_vm6 = vcmp.ge.f32.partialorder %v458_v33, %v464_v23 }
  0xc4   : > { %vm487_vm7 = vmand %vm471_vm2, %vm483_vm1 }
  0xc5   : > { %vm488_vm12 = vmand %vm472_vm6, %vm484_vm5 }
  0xc6   : > { %v481_v27 = vpop.permute.xlu1 %480  ;;  %v469_v29 = vpop.permute.xlu0 %468 }
  0xc7   : > { %vm485_vm3 = vcmp.lt.f32.partialorder %v454_v30, %v481_v27  ;;  %vm473_vm4 = vcmp.ge.f32.partialorder %v454_v30, %v469_v29  ;;  %vm486_vm8 = vcmp.lt.f32.partialorder %v458_v33, %v481_v27  ;;  %vm474_vm9 = vcmp.ge.f32.partialorder %v458_v33, %v469_v29 }
  0xc8   : > { %vm489_vm10 = vmand %vm473_vm4, %vm485_vm3 }
  0xc9   : > { %vm490_vm14 = vmand %vm474_vm9, %vm486_vm8 }
  0xcb   : > { %v508_v37 = vpop.permute.xlu1 %507  ;;  %v504_v43 = vpop.permute.xlu0 %503 }
  0xcc   : > { %vm512_vm11 = vcmp.ge.f32.partialorder %v495_v36, %v508_v37  ;;  %vm510_vm13 = vcmp.ge.f32.partialorder %v495_v36, %v504_v43  ;;  %vm511_vm15 = vcmp.ge.f32.partialorder %v499_v40, %v504_v43  ;;  %vm513_vm0 = vcmp.ge.f32.partialorder %v499_v40, %v508_v37 }
  0xcd   : > { %vm1117_vm1 = vmand %vm489_vm10, %vm512_vm11 }
  0xce   : > { %vm514_vm2 = vmand %vm487_vm7, %vm510_vm13 }
  0xcf   : > { %vm515_vm4 = vmand %vm488_vm12, %vm511_vm15 }
  0xd0   : > { %v520_v45 = vpop.permute.xlu1 %519  ;;  %v524_v47 = vpop.permute.xlu0 %523  ;;  %vm1123_vm6 = vmand %vm490_vm14, %vm513_vm0 }
  0xd1   : > { %vm526_vm3 = vcmp.lt.f32.partialorder %v495_v36, %v520_v45  ;;  %vm527_vm5 = vcmp.lt.f32.partialorder %v499_v40, %v520_v45  ;;  %vm528_vm8 = vcmp.lt.f32.partialorder %v495_v36, %v524_v47  ;;  %vm529_vm10 = vcmp.lt.f32.partialorder %v499_v40, %v524_v47 }
  0xd2   : > { %vm530_vm9 = vmand %vm514_vm2, %vm526_vm3 }
  0xd3   : > { %vm531_vm7 = vmand %vm515_vm4, %vm527_vm5 }
  0xd4   : > { %vm532_vm11 = vmand %vm1117_vm1, %vm528_vm8 }
  0xd5   : > { %vm533_vm12 = vmand %vm1123_vm6, %vm529_vm10 }
 0x117   : > { %v411_v14 = vpop.f32.mrb[0].mxu0 }
 0x118   : > { %v715_v15 = vmul.f32 -1.442695, %v411_v14  ;;  %v413_v16 = vpop.f32.mrb[1].mxu0 }
 0x119   : > { %v716_v17 = vmul.f32 -1.442695, %v413_v16  ;;  %v415_v18 = vpop.f32.mrb[2].mxu0 }
 0x11a   : > { %811 = vpow2.f32 %v715_v15  ;;  %v717_v20 = vmul.f32 -1.442695, %v415_v18  ;;  %v417_v22 = vpop.f32.mrb[3].mxu0 }
 0x11b   : > { %813 = vpow2.f32 %v716_v17  ;;  %v718_v24 = vmul.f32 -1.442695, %v417_v22 }
 0x11c   : > { %815 = vpow2.f32 %v717_v20 }
 0x11d   : > { %817 = vpow2.f32 %v718_v24 }
 0x124   : > { %v812_v32 = vpop.eup %811 }
 0x125   : > { %v814_v34 = vpop.eup %813  ;;  %v432_v35 = vadd.f32 1.0, %v812_v32 }
 0x126   : > { %v816_v38 = vpop.eup %815  ;;  %v433_v39 = vadd.f32 1.0, %v814_v34 }
 0x127   : > { %v818_v41 = vpop.eup %817  ;;  %819 = vrcp.f32 %v432_v35  ;;  %v434_v42 = vadd.f32 1.0, %v816_v38 }
 0x128   : > { %821 = vrcp.f32 %v433_v39  ;;  %v435_v44 = vadd.f32 1.0, %v818_v41 }
 0x129   : > { %823 = vrcp.f32 %v434_v42 }
 0x12a   : > { %825 = vrcp.f32 %v435_v44 }
 0x131   : > { %v820_v49 = vpop.eup %819 }
 0x132   : > { %v822_v50 = vpop.eup %821  ;;  %v534_v51 = vsel %vm530_vm9, %v820_v49, 0.0 }
 0x133   : > { %v824_v52 = vpop.eup %823  ;;  %v535_v53 = vsel %vm531_vm7, %v822_v50, 0.0  ;;  %538 = vst [vmem:[%s318_s14] sm:$0xff] %v534_v51 }
 0x134   : > { %v826_v54 = vpop.eup %825  ;;  %539 = vst [vmem:[%s318_s14 + $0x8] sm:$0xff] %v535_v53  ;;  %v536_v55 = vsel %vm532_vm11, %v824_v52, 0.0 }
 0x135   : > { %v537_v56 = vsel %vm533_vm12, %v826_v54, 0.0  ;;  %540 = vst [vmem:[%s318_s14 + $0x10] sm:$0xff] %v536_v55 }
 0x136   : > { %541 = vst [vmem:[%s318_s14 + $0x18] sm:$0xff] %v537_v56 }
 0x137   : > { %870 = shalt.err (!%p867_p4)
}
 0x138   : > { %s871_s25 = scalar_lea.hbm %s1135_s24, 512  ;;  %s875_s11 = scalar_lea.hbm %s1191_s5, 1024 }
 0x139   : > { %p872_p7 = scmp.ne.s32.totalorder %s1135_s24, %s871_s25  ;;  %p876_p1 = scmp.lt.u32.totalorder %s1135_s24, %s1191_s5 }
 0x13a   : > { %p877_p3 = scmp.lt.u32.totalorder %s875_s11, %s871_s25  ;;  %p879_p8 = scmp.lt.u32.totalorder %s871_s25, %s1135_s24 }
 0x13b   : > { %p873_p10 = pnand %p872_p7, %p1203_p11 }
 0x13c   : > { %p878_p9 = por %p877_p3, %p876_p1 }
 0x13d   : > { %p874_p12 = pneg %p873_p10 }
 0x13e   : > { %p880_p0 = por %p879_p8, %p878_p9 }
 0x140   : > { %p881_p6 = pnand %p880_p0, %p874_p12 }
 0x142   : > { %884 = shalt.err (!%p881_p6)
}
 0x143   : > { %s949_s28 = smov 256   ;;  %s950_s21 = smov 16  }
 0x144   : > { %730 = dma.vmem_to_hbm [thread:$0]  (%p1203_p11), %s1128_s16, 512, %s1135_s24, %s543_s9, %s949_s28, %s949_s28, %s950_s21  }
 0x145 PF: > { %s573_s12 = sand.u32 1, %s919_s18   ;;  %p1204_p13 = scmp.ne.s32.totalorder %s1196_s8, 0 }
 0x146   : > { %p1205_p2 = scmp.ge.s32.totalorder %s939_s23, 2  ;;  %s574_s13 = scalar_lea.sflag [#allocation4], %s573_s12 }
 0x148   : > { %p737_p5 = pnand %p1205_p2, %p1204_p13 }
 0x14a   : > { %914 = dma.done.wait (!%p737_p5), %s574_s13, 512  }
 0x14b   : > { %916 = vsyncadd (!%p737_p5), %s574_s13, 4294966784  ;;  %s21_s23 = sadd.s32 1, %s939_s23   ;;  %s1206_s18 = smov %s923_s19 }
 0x14c   : > { %p18_p4 = scmp.ge.s32.totalorder %s21_s23, 4   ;;  %s1207_s19 = smov %s927_s20 }
 0x14d   : > { %s1208_s20 = smov %s1037_s7  ;;  %s1209_s21 = smov %s935_s22 }
 0x14e   : > { %s1210_s22 = smov %s1212_s26  ;;  %20 = sbr.rel (!%p18_p4) target bundleno = 6 (0x6), region = 97 }
 0x155   :  { %579 = vsyncpa [#allocation3], 1 }
 0x156   :  { %581 = vsyncpa [#allocation3 + $0x1], 1 }
 0x157   :  { %582 = vsyncpa [#allocation4], 1 }
 0x158   :  { %584 = vsyncpa [#allocation4 + $0x1], 1 }

</bundles_post_ra>
